<compile_context>
chip_gen: v5e
topology: v5e:2x2
jax: 0.10.0
libtpu: 0.0.40
codegen_flags: <defaults>
</compile_context>

<pallas_src>
import functools
import math

import jax
import jax.numpy as jnp
from jax import lax
from jax.experimental import pallas as pl
from jax.experimental.pallas import tpu as pltpu


def _sdpa_kernel(q_ref, k_ref, v_ref, ctx_ref, attn_ref, *, scale, compute_dtype):
    # q_ref: (G, TQ, D); k_ref/v_ref: (G, S, D); ctx_ref: (G, TQ, D); attn_ref: (G, TQ, S)

    # Fold the softmax scale into Q (the small (TQ, D) operand). Apply it in
    # f32 before any downcast so bf16 compute does not lose the scale.
    q = (q_ref[...].astype(jnp.float32) * scale).astype(compute_dtype)
    k = k_ref[...].astype(compute_dtype)

    # scores = (Q/sqrt(d_k)) @ K^T: contraction over D, batched over the packed
    # head axis -> (G, TQ, S), f32 accumulation on the MXU.
    scores = lax.dot_general(
        q, k,
        dimension_numbers=(((2,), (2,)), ((0,), (0,))),
        preferred_element_type=jnp.float32,
    )

    # Numerically-stable softmax over keys, kept in f32. Exact reciprocal so
    # the returned attention matches jax.nn.softmax to tight tolerance.
    m = jnp.max(scores, axis=-1, keepdims=True)
    e = jnp.exp(scores - m)
    denom = jnp.sum(e, axis=-1, keepdims=True)
    attn = e * pl.reciprocal(denom, approx=False)
    attn_ref[...] = attn.astype(attn_ref.dtype)

    # context = attn @ V, f32 accumulation.
    v = v_ref[...].astype(compute_dtype)
    ctx = lax.dot_general(
        attn.astype(compute_dtype), v,
        dimension_numbers=(((2,), (1,)), ((0,), (0,))),
        preferred_element_type=jnp.float32,
    )
    ctx_ref[...] = ctx.astype(ctx_ref.dtype)


# Keep the steady-state working set comfortably below the default scoped VMEM
# limit (16 MiB on v5e, 32 MiB on v6e/v7x) so we never rely on raising it.
_VMEM_BUDGET = 12 * 1024 * 1024


def _per_step_bytes(g, tq, s, d, itemsize):
    # Pipelined (double-buffered) I/O tiles: Q, K, V, ctx, attn.
    io = itemsize * g * (tq * d + s * d + s * d + tq * d + tq * s)
    # f32 in-kernel intermediates (scores, exp/attn, ctx accumulator).
    scratch = 4 * g * (2 * tq * s + tq * d)
    return 2 * io + scratch


def _pick_q_block(S):
    # MXU-friendly query tile (256 preferred for the 2x256 MXU on v6e/v7x,
    # 128 otherwise); fall back to the whole sequence for small / odd S.
    for cand in (256, 128):
        if S % cand == 0:
            return cand
    return S


def _pick_heads_per_block(BH, TQ, S, D, itemsize):
    # Pack multiple heads per grid step when per-head tiles are tiny, so the
    # output writeback stays dense and the ~0.35us fixed per-step overhead is
    # amortized — while keeping the full per-step footprint inside the budget.
    for g in range(BH, 0, -1):
        if BH % g == 0 and _per_step_bytes(g, TQ, S, D, itemsize) <= _VMEM_BUDGET:
            return g
    return 1


def scaled_dot_product_attention(Q, K, V, d_k, *, q_block=None,
                                 heads_per_block=None, compute_dtype=None):
    """Q, K, V: [B, H, S, D]. Returns (context [B,H,S,D], attn [B,H,S,S])."""
    B, H, S, D = Q.shape
    BH = B * H
    q = Q.reshape(BH, S, D)
    k = K.reshape(BH, S, D)
    v = V.reshape(BH, S, D)

    if compute_dtype is None:
        # Keep the input dtype so f32 inputs reproduce the reference exactly;
        # pass jnp.bfloat16 explicitly for MXU-bound speed on v6e/v7x.
        compute_dtype = Q.dtype
    scale = 1.0 / math.sqrt(d_k)

    TQ = q_block if q_block is not None else _pick_q_block(S)
    TQ = min(TQ, S)
    assert S % TQ == 0, "q_block must divide the sequence length"

    itemsize = jnp.dtype(Q.dtype).itemsize

    # Shrink the query tile if even a single head would blow the VMEM budget
    # (very long sequences): the attn tile scales with TQ*S.
    while (_per_step_bytes(1, TQ, S, D, itemsize) > _VMEM_BUDGET
           and TQ > 128 and TQ % 2 == 0 and S % (TQ // 2) == 0):
        TQ //= 2

    G = (heads_per_block if heads_per_block is not None
         else _pick_heads_per_block(BH, TQ, S, D, itemsize))
    assert BH % G == 0, "heads_per_block must divide B*H"

    # Only raise the scoped VMEM limit if the (already minimized) footprint
    # still needs it; cap below v7x's 64 MiB physical VMEM.
    needed = _per_step_bytes(G, TQ, S, D, itemsize) + (2 << 20)
    vmem_limit = min(needed, 60 * 1024 * 1024) if needed > (30 << 20) else None

    # Query axis innermost: the K/V block index is constant across it, so the
    # pipeline reuses the resident K/V tiles instead of re-fetching from HBM.
    grid = (BH // G, S // TQ)

    q_spec = pl.BlockSpec((G, TQ, D), lambda h, qb: (h, qb, 0))
    kv_spec = pl.BlockSpec((G, S, D), lambda h, qb: (h, 0, 0))
    ctx_spec = pl.BlockSpec((G, TQ, D), lambda h, qb: (h, qb, 0))
    attn_spec = pl.BlockSpec((G, TQ, S), lambda h, qb: (h, qb, 0))

    kernel = functools.partial(_sdpa_kernel, scale=scale, compute_dtype=compute_dtype)

    # TODO(synk): if the caller never consumes `attn`, drop the [BH,S,S] output
    # and switch to a KV-tiled online-softmax (flash) formulation to remove the
    # O(S^2) HBM writeback.
    ctx, attn = pl.pallas_call(
        kernel,
        out_shape=(
            jax.ShapeDtypeStruct((BH, S, D), Q.dtype),
            jax.ShapeDtypeStruct((BH, S, S), Q.dtype),
        ),
        grid_spec=pltpu.PrefetchScalarGridSpec(
            num_scalar_prefetch=0,
            grid=grid,
            in_specs=[q_spec, kv_spec, kv_spec],
            out_specs=[ctx_spec, attn_spec],
        ),
        compiler_params=pltpu.CompilerParams(
            dimension_semantics=("parallel", "parallel"),
            vmem_limit_bytes=vmem_limit,
        ),
    )(q, k, v)

    return ctx.reshape(B, H, S, D), attn.reshape(B, H, S, S)


if __name__ == "__main__":
    # Small deterministic inputs consistent with the module's forward.
    B, H, S, D = 2, 2, 8, 32   # d_k = D
    key = jax.random.PRNGKey(0)
    kq, kk, kv = jax.random.split(key, 3)
    Q = jax.random.normal(kq, (B, H, S, D), dtype=jnp.float32)
    K = jax.random.normal(kk, (B, H, S, D), dtype=jnp.float32)
    V = jax.random.normal(kv, (B, H, S, D), dtype=jnp.float32)

    ctx, attn = scaled_dot_product_attention(Q, K, V, d_k=D)
    jax.block_until_ready((ctx, attn))

    # Reference check in plain JAX (same math as the PyTorch module).
    scores_ref = jnp.einsum("bhqd,bhkd->bhqk", Q, K) / jnp.sqrt(jnp.float32(D))
    attn_ref = jax.nn.softmax(scores_ref, axis=-1)
    ctx_ref = jnp.einsum("bhqk,bhkd->bhqd", attn_ref, V)

    assert jnp.allclose(attn, attn_ref, atol=1e-5, rtol=1e-5)
    assert jnp.allclose(ctx, ctx_ref, atol=1e-5, rtol=1e-5)

    print("KERNEL_OK")
</pallas_src>

<mosaic_0001>
module attributes {stable_mosaic.version = 11 : i64} {
  func.func @_sdpa_kernel(%arg0: i32, %arg1: i32, %arg2: memref<4x8x32xf32, #tpu.memory_space<vmem>>, %arg3: memref<4x8x32xf32, #tpu.memory_space<vmem>>, %arg4: memref<4x8x32xf32, #tpu.memory_space<vmem>>, %arg5: memref<4x8x32xf32, #tpu.memory_space<vmem>>, %arg6: memref<4x8x8xf32, #tpu.memory_space<vmem>>) attributes {dimension_semantics = [#tpu.dimension_semantics<parallel>, #tpu.dimension_semantics<parallel>], iteration_bounds = array<i64: 1, 1>, scalar_prefetch = 0 : i64, scratch_operands = 0 : i64, tpu.core_type = #tpu.core_type<tc>, window_params = [{transform_indices = @transform_0, window_bounds = array<i64: 4, 8, 32>}, {transform_indices = @transform_1, window_bounds = array<i64: 4, 8, 32>}, {transform_indices = @transform_2, window_bounds = array<i64: 4, 8, 32>}, {transform_indices = @transform_3, window_bounds = array<i64: 4, 8, 32>}, {transform_indices = @transform_4, window_bounds = array<i64: 4, 8, 8>}]} {
    %c0 = arith.constant 0 : index
    %c0_0 = arith.constant 0 : index
    %c0_1 = arith.constant 0 : index
    %0 = vector.load %arg2[%c0, %c0_0, %c0_1] : memref<4x8x32xf32, #tpu.memory_space<vmem>>, vector<4x8x32xf32>
    %cst = arith.constant 0.176776692 : f32
    %1 = vector.broadcast %cst : f32 to vector<4x8x32xf32>
    %2 = arith.mulf %0, %1 : vector<4x8x32xf32>
    %c0_2 = arith.constant 0 : index
    %c0_3 = arith.constant 0 : index
    %c0_4 = arith.constant 0 : index
    %3 = vector.load %arg3[%c0_2, %c0_3, %c0_4] : memref<4x8x32xf32, #tpu.memory_space<vmem>>, vector<4x8x32xf32>
    %cst_5 = arith.constant dense<0.000000e+00> : vector<4x8x8xf32>
    %4 = tpu.matmul %2, %3, %cst_5 {dimension_numbers = #tpu.dot_dimension_numbers<[2], [2], [1], [1], [0, 0, 0, 1, 1, 1], [0], [0]>} : vector<4x8x32xf32>, vector<4x8x32xf32>, vector<4x8x8xf32> -> vector<4x8x8xf32>
    %cst_6 = arith.constant dense<0xFF800000> : vector<4x8xf32>
    %5 = vector.multi_reduction <maximumf>, %4, %cst_6 [2] : vector<4x8x8xf32> to vector<4x8xf32>
    %6 = vector.shape_cast %5 : vector<4x8xf32> to vector<4x8x1xf32>
    %7 = vector.broadcast %6 : vector<4x8x1xf32> to vector<4x8x8xf32>
    %8 = arith.subf %4, %7 : vector<4x8x8xf32>
    %9 = math.exp %8 : vector<4x8x8xf32>
    %cst_7 = arith.constant dense<0.000000e+00> : vector<4x8xf32>
    %10 = vector.multi_reduction <add>, %9, %cst_7 [2] : vector<4x8x8xf32> to vector<4x8xf32>
    %11 = vector.shape_cast %10 : vector<4x8xf32> to vector<4x8x1xf32>
    %12 = tpu.reciprocal %11 : vector<4x8x1xf32> -> vector<4x8x1xf32>
    %13 = vector.broadcast %12 : vector<4x8x1xf32> to vector<4x8x8xf32>
    %14 = arith.mulf %9, %13 : vector<4x8x8xf32>
    %c0_8 = arith.constant 0 : index
    %c0_9 = arith.constant 0 : index
    %c0_10 = arith.constant 0 : index
    %15 = vector.load %arg6[%c0_8, %c0_9, %c0_10] : memref<4x8x8xf32, #tpu.memory_space<vmem>>, vector<4x8x8xf32>
    tpu.vector_store %arg6[%c0_8, %c0_9, %c0_10], %14 {strides = array<i32>} : memref<4x8x8xf32, #tpu.memory_space<vmem>>, vector<4x8x8xf32>,
    %c0_11 = arith.constant 0 : index
    %c0_12 = arith.constant 0 : index
    %c0_13 = arith.constant 0 : index
    %16 = vector.load %arg4[%c0_11, %c0_12, %c0_13] : memref<4x8x32xf32, #tpu.memory_space<vmem>>, vector<4x8x32xf32>
    %cst_14 = arith.constant dense<0.000000e+00> : vector<4x8x32xf32>
    %17 = tpu.matmul %14, %16, %cst_14 {dimension_numbers = #tpu.dot_dimension_numbers<[2], [1], [1], [2], [0, 0, 0, 1, 1, 2], [0], [0]>} : vector<4x8x8xf32>, vector<4x8x32xf32>, vector<4x8x32xf32> -> vector<4x8x32xf32>
    %c0_15 = arith.constant 0 : index
    %c0_16 = arith.constant 0 : index
    %c0_17 = arith.constant 0 : index
    %18 = vector.load %arg5[%c0_15, %c0_16, %c0_17] : memref<4x8x32xf32, #tpu.memory_space<vmem>>, vector<4x8x32xf32>
    tpu.vector_store %arg5[%c0_15, %c0_16, %c0_17], %17 {strides = array<i32>} : memref<4x8x32xf32, #tpu.memory_space<vmem>>, vector<4x8x32xf32>,
    return
  }
  func.func @transform_0(%arg0: i32, %arg1: i32) -> (i32, i32, i32) {
    %c0_i32 = arith.constant 0 : i32
    %c0_i32_0 = arith.constant 0 : i32
    return %arg0, %arg1, %c0_i32 : i32, i32, i32
  }
  func.func @transform_1(%arg0: i32, %arg1: i32) -> (i32, i32, i32) {
    %c0_i32 = arith.constant 0 : i32
    %c0_i32_0 = arith.constant 0 : i32
    %c0_i32_1 = arith.constant 0 : i32
    return %arg0, %c0_i32, %c0_i32_0 : i32, i32, i32
  }
  func.func @transform_2(%arg0: i32, %arg1: i32) -> (i32, i32, i32) {
    %c0_i32 = arith.constant 0 : i32
    %c0_i32_0 = arith.constant 0 : i32
    %c0_i32_1 = arith.constant 0 : i32
    return %arg0, %c0_i32, %c0_i32_0 : i32, i32, i32
  }
  func.func @transform_3(%arg0: i32, %arg1: i32) -> (i32, i32, i32) {
    %c0_i32 = arith.constant 0 : i32
    %c0_i32_0 = arith.constant 0 : i32
    return %arg0, %arg1, %c0_i32 : i32, i32, i32
  }
  func.func @transform_4(%arg0: i32, %arg1: i32) -> (i32, i32, i32) {
    %c0_i32 = arith.constant 0 : i32
    %c0_i32_0 = arith.constant 0 : i32
    return %arg0, %arg1, %c0_i32 : i32, i32, i32
  }
}

</mosaic_0001>

<bundles_post_ra>
// kernel: tpu_custom_call.1
= control target key start
LH: loop header
LB: loop body
LE: loop exit
PB: predicated region body
PF: predicated region fallthrough
CT: control target
= control target key end

     0   :  { %10 = vsyncpa [#allocation3], 0  ;;  %s686_s0 = inlined_call_operand.hbm [shape: f32[4,8,32], index: 0, kind: input, shape index: {}]   ;;  %s687_s1 = inlined_call_operand.hbm [shape: f32[4,8,32], index: 1, kind: input, shape index: {}]   ;;  %s688_s2 = inlined_call_operand.hbm [shape: f32[4,8,32], index: 2, kind: input, shape index: {}]   ;;  %s689_s3 = inlined_call_operand.hbm [shape: f32[4,8,32], index: 3, kind: output, shape index: {0}]   ;;  %s690_s4 = inlined_call_operand.hbm [shape: f32[4,8,8], index: 4, kind: output, shape index: {1}]  }
   0x1   :  { %11 = vsyncpa [#allocation6], 0 }
   0x2   :  { %12 = vsyncpa [#allocation4], 0 }
   0x3   :  { %13 = vsyncpa [#allocation10], 0  ;;  %s31_s17 = sshll.u32 %s687_s1, 4  ;;  %s584_s18 = smov [#allocation5]   ;;  %s32_s17 = int_to_ptr.hbm [resolvable:$true] %s31_s17 }
   0x4   :  { %s33_s19 = sshll.u32 %s584_s18, 4  ;;  %s18_s22 = sshll.u32 %s686_s0, 4  ;;  %s34_s19 = int_to_ptr.vmem [resolvable:$true] %s33_s19  ;;  %s19_s22 = int_to_ptr.hbm [resolvable:$true] %s18_s22 }
   0x5   :  { %s585_s23 = smov 128   ;;  %s586_s24 = smov 8  }
   0x6   :  { %39 = dma.hbm_to_vmem [thread:$0]  %s32_s17, 512, %s34_s19, [#allocation6], %s585_s23, %s585_s23, %s586_s24  }
   0x7   :  { %s587_s25 = smov [#allocation2]   ;;  %s44_s1 = sshll.u32 %s688_s2, 4  ;;  %s45_s1 = int_to_ptr.hbm [resolvable:$true] %s44_s1 }
   0x8   :  { %s20_s26 = sshll.u32 %s587_s25, 4  ;;  %s588_s0 = smov [#allocation7]   ;;  %s21_s26 = int_to_ptr.vmem [resolvable:$true] %s20_s26 }
   0x9   :  { %26 = dma.hbm_to_vmem [thread:$0]  %s19_s22, 512, %s21_s26, [#allocation3], %s585_s23, %s585_s23, %s586_s24  }
   0xa   :  { %s46_s29 = sshll.u32 %s588_s0, 4  ;;  %s47_s29 = int_to_ptr.vmem [resolvable:$true] %s46_s29 }
   0xb   :  { %52 = dma.hbm_to_vmem [thread:$0]  %s45_s1, 512, %s47_s29, [#allocation6], %s585_s23, %s585_s23, %s586_s24  }
   0xc   :  { %576 = dma.done.wait [#allocation3], 512  }
   0xd   :  { %577 = vsyncadd [#allocation3], 4294966784 }
   0xe   :  { %578 = dma.done.wait [#allocation6], 1024  }
   0xf   :  { %579 = vsyncadd [#allocation6], 4294966272  ;;  %vm77_vm0 = vcmask 261120   ;;  %v73_v0 = vld [vmem:[#allocation5] sm:$0xff]  ;;  %v75_v1 = vld [vmem:[#allocation5 + $0x10] sm:$0xff]  ;;  %vm182_vm1 = vcmask 64512  }
  0x10   :  { %v65_v2 = vld [vmem:[#allocation2] sm:$0xff]  ;;  %421 = vmatpush.xpose.msk.msra.mxu0 %vm77_vm0, %v73_v0  ;;  %425 = vmatpush.xpose.msk.msra.mxu2 %vm77_vm0, %v75_v1  ;;  %v67_v4 = vld [vmem:[#allocation2 + $0x10] sm:$0xff]  ;;  %v74_v5 = vld [vmem:[#allocation5 + $0x8] sm:$0xff]  ;;  %s589_s2 = smov [#allocation9]   ;;  %s402_s7 = sshll.u32 %s690_s4, 4  ;;  %s403_s7 = int_to_ptr.hbm [resolvable:$true] %s402_s7 }
  0x11   :  { %v69_v3 = vmul.f32 0.17677669, %v65_v2  ;;  %v76_v6 = vld [vmem:[#allocation5 + $0x18] sm:$0xff]  ;;  %v71_v7 = vmul.f32 0.17677669, %v67_v4  ;;  %423 = vmatpush.xpose.msk.msra.mxu1 %vm77_vm0, %v74_v5  ;;  %v66_v8 = vld [vmem:[#allocation2 + $0x8] sm:$0xff] }
  0x12   :  { %427 = vmatpush.xpose.msk.msra.mxu3 %vm77_vm0, %v76_v6  ;;  %v68_v9 = vld [vmem:[#allocation2 + $0x18] sm:$0xff]  ;;  %v70_v10 = vmul.f32 0.17677669, %v66_v8  ;;  %v283_v40 = vld [vmem:[#allocation7] sm:$0xff]  ;;  %v285_v41 = vld [vmem:[#allocation7 + $0x10] sm:$0xff]  ;;  %s400_s30 = sshll.u32 %s589_s2, 4  ;;  %s401_s30 = int_to_ptr.vmem [resolvable:$true] %s400_s30 }
  0x13   :  { %v72_v11 = vmul.f32 0.17677669, %v68_v9  ;;  %422 = vmatmul.msk.f32.vlgmr.msra.gmra.mxu0 %vm77_vm0, %v69_v3  ;;  %426 = vmatmul.msk.f32.vlgmr.msra.gmra.mxu2 %vm77_vm0, %v71_v7  ;;  %v284_v42 = vld [vmem:[#allocation7 + $0x8] sm:$0xff]  ;;  %v286_v43 = vld [vmem:[#allocation7 + $0x18] sm:$0xff]  ;;  %s590_s8 = smov [#allocation8]   ;;  %s389_s4 = sshll.u32 %s689_s3, 4  ;;  %s390_s4 = int_to_ptr.hbm [resolvable:$true] %s389_s4 }
  0x14   :  { %424 = vmatmul.msk.f32.vlgmr.msra.gmra.mxu1 %vm77_vm0, %v70_v10  ;;  %305 = vmatpush.msrb.mxu0 %v283_v40  ;;  %s387_s9 = sshll.u32 %s590_s8, 4  ;;  %s388_s9 = int_to_ptr.vmem [resolvable:$true] %s387_s9 }
  0x15   :  { %428 = vmatmul.msk.f32.vlgmr.msra.gmra.mxu3 %vm77_vm0, %v72_v11  ;;  %351 = vmatpush.msrb.mxu2 %v285_v41 }
  0x16   :  { %328 = vmatpush.msrb.mxu1 %v284_v42  ;;  %374 = vmatpush.msrb.mxu3 %v286_v43 }
  0x90   :  { %v101_v12 = vpop.f32.mrf.mxu0 }
  0x91   :  { %v183_v13 = vsel %vm182_vm1, %v101_v12, -inf  ;;  %v127_v14 = vpop.f32.mrf.mxu1 }
  0x92   :  { %184 = vmax.xlane.f32.xlu1 %v183_v13  ;;  %v186_v17 = vsel %vm182_vm1, %v127_v14, -inf }
  0x96   :  { %v153_v15 = vpop.f32.mrf.mxu2 }
  0x97   :  { %v189_v16 = vsel %vm182_vm1, %v153_v15, -inf }
  0x98   :  { %190 = vmax.xlane.f32.xlu0 %v189_v16  ;;  %v179_v18 = vpop.f32.mrf.mxu3 }
  0x99   :  { %v192_v19 = vsel %vm182_vm1, %v179_v18, -inf }
  0x9a   :  { %187 = vmax.xlane.f32.xlu1 %v186_v17 }
  0xa0   :  { %193 = vmax.xlane.f32.xlu0 %v192_v19 }
 0x105   :  { %v185_v20 = vpop.xlane.xlu1 %184 }
 0x106   :  { %v195_v21 = vsub.f32 %v101_v12, %v185_v20 }
 0x108   :  { %v199_v22 = vmul.f32 1.442695, %v195_v21 }
 0x10a   :  { %440 = vpow2.f32 %v199_v22 }
 0x10b   :  { %v191_v23 = vpop.xlane.xlu0 %190 }
 0x10c   :  { %v197_v24 = vsub.f32 %v153_v15, %v191_v23 }
 0x10d   :  { %v188_v25 = vpop.xlane.xlu1 %187 }
 0x10e   :  { %v203_v26 = vmul.f32 1.442695, %v197_v24  ;;  %v196_v27 = vsub.f32 %v127_v14, %v188_v25 }
 0x110   :  { %v441_v28 = vpop.eup %440  ;;  %442 = vpow2.f32 %v203_v26  ;;  %v201_v29 = vmul.f32 1.442695, %v196_v27 }
 0x111   :  { %v207_v30 = vsel %vm182_vm1, %v441_v28, 0.0 }
 0x112   :  { %444 = vpow2.f32 %v201_v29  ;;  %208 = vadd.xlane.f32.xlu0 %v207_v30 }
 0x113   :  { %v194_v31 = vpop.xlane.xlu0 %193 }
 0x114   :  { %v198_v32 = vsub.f32 %v179_v18, %v194_v31 }
 0x116   :  { %v647_v33 = vpop.eup %442  ;;  %v205_v34 = vmul.f32 1.442695, %v198_v32 }
 0x117   :  { %v213_v35 = vsel %vm182_vm1, %v647_v33, 0.0 }
 0x118   :  { %v651_v36 = vpop.eup %444  ;;  %446 = vpow2.f32 %v205_v34  ;;  %214 = vadd.xlane.f32.xlu2 %v213_v35 }
 0x119   :  { %v210_v37 = vsel %vm182_vm1, %v651_v36, 0.0 }
 0x11a   :  { %211 = vadd.xlane.f32.xlu1 %v210_v37 }
 0x11e   :  { %v655_v38 = vpop.eup %446 }
 0x11f   :  { %v216_v39 = vsel %vm182_vm1, %v655_v38, 0.0 }
 0x120   :  { %217 = vadd.xlane.f32.xlu2 %v216_v39 }
 0x185   :  { %v209_v44 = vpop.xlane.xlu0 %208 }
 0x186   :  { %448 = vrcp.f32 %v209_v44  ;;  %v230_v50 = vand.u32 2147483648, %v209_v44  ;;  %v228_v52 = vand.u32 2147483647, %v209_v44  ;;  %vm224_vm3 = vweird.f32 %v209_v44 }
 0x188   :  { %v231_v58 = vor.u32 1.1754944e-38, %v230_v50  ;;  %vm229_vm5 = vcmp.eq.f32.partialorder %v228_v52, 8.507059e+37 }
 0x18b   :  { %v215_v45 = vpop.xlane.xlu2 %214 }
 0x18c   :  { %v449_v46 = vpop.eup %448  ;;  %450 = vrcp.f32 %v215_v45  ;;  %v256_v62 = vand.u32 2147483647, %v215_v45  ;;  %v258_v63 = vand.u32 2147483648, %v215_v45  ;;  %vm252_vm7 = vweird.f32 %v215_v45 }
 0x18d   :  { %v220_v47 = vmul.f32 %v449_v46, %v209_v44  ;;  %v212_v48 = vpop.xlane.xlu1 %211  ;;  %vm225_vm2 = vweird.f32 %v449_v46 }
 0x18e   :  { %452 = vrcp.f32 %v212_v48  ;;  %vm226_vm4 = vmor %vm224_vm3, %vm225_vm2  ;;  %v244_v4 = vand.u32 2147483648, %v212_v48  ;;  %v242_v7 = vand.u32 2147483647, %v212_v48  ;;  %vm257_vm10 = vcmp.eq.f32.partialorder %v256_v62, 8.507059e+37 }
 0x18f   :  { %v221_v49 = vsub.f32 1.0, %v220_v47  ;;  %v259_v9 = vor.u32 1.1754944e-38, %v258_v63  ;;  %vm238_vm11 = vweird.f32 %v212_v48 }
 0x190   :  { %v245_v13 = vor.u32 1.1754944e-38, %v244_v4  ;;  %vm243_vm13 = vcmp.eq.f32.partialorder %v242_v7, 8.507059e+37 }
 0x191   :  { %v222_v51 = vmul.f32 %v449_v46, %v221_v49 }
 0x192   :  { %v451_v53 = vpop.eup %450 }
 0x193   :  { %v223_v54 = vadd.f32 %v449_v46, %v222_v51  ;;  %v248_v55 = vmul.f32 %v451_v53, %v215_v45  ;;  %v218_v56 = vpop.xlane.xlu2 %217  ;;  %vm253_vm6 = vweird.f32 %v451_v53 }
 0x194   :  { %v453_v57 = vpop.eup %452  ;;  %454 = vrcp.f32 %v218_v56  ;;  %vm254_vm9 = vmor %vm252_vm7, %vm253_vm6  ;;  %v272_v18 = vand.u32 2147483648, %v218_v56  ;;  %v270_v21 = vand.u32 2147483647, %v218_v56  ;;  %vm266_vm15 = vweird.f32 %v218_v56 }
 0x195   :  { %v227_v59 = vsel %vm226_vm4, %v449_v46, %v223_v54  ;;  %v249_v60 = vsub.f32 1.0, %v248_v55  ;;  %v234_v61 = vmul.f32 %v453_v57, %v212_v48  ;;  %vm239_vm8 = vweird.f32 %v453_v57 }
 0x196   :  { %v232_v0 = vsel %vm229_vm5, %v231_v58, %v227_v59  ;;  %vm240_vm12 = vmor %vm238_vm11, %vm239_vm8  ;;  %v273_v24 = vor.u32 1.1754944e-38, %v272_v18  ;;  %vm271_vm3 = vcmp.eq.f32.partialorder %v270_v21, 8.507059e+37 }
 0x197   :  { %v250_v1 = vmul.f32 %v451_v53, %v249_v60  ;;  %v235_v2 = vsub.f32 1.0, %v234_v61  ;;  %v275_v3 = vmul.f32 %v441_v28, %v232_v0 }
 0x199   :  { %v251_v5 = vadd.f32 %v451_v53, %v250_v1  ;;  %v236_v6 = vmul.f32 %v453_v57, %v235_v2  ;;  %429 = vmatmul.msk.f32.vlgmr.msrb.gmra.mxu0 %vm182_vm1, %v275_v3  ;;  %279 = vst.msk [vmem:[#allocation9] sm:$0xff] %vm182_vm1, %v275_v3 }
 0x19a   :  { %v455_v8 = vpop.eup %454 }
 0x19b   :  { %v237_v10 = vadd.f32 %v453_v57, %v236_v6  ;;  %v262_v11 = vmul.f32 %v455_v8, %v218_v56  ;;  %v255_v12 = vsel %vm254_vm9, %v451_v53, %v251_v5  ;;  %vm267_vm14 = vweird.f32 %v455_v8 }
 0x19c   :  { %v260_v14 = vsel %vm257_vm10, %v259_v9, %v255_v12  ;;  %vm268_vm2 = vmor %vm266_vm15, %vm267_vm14 }
 0x19d   :  { %v241_v15 = vsel %vm240_vm12, %v453_v57, %v237_v10  ;;  %v263_v16 = vsub.f32 1.0, %v262_v11  ;;  %v277_v17 = vmul.f32 %v647_v33, %v260_v14 }
 0x19e   :  { %v246_v19 = vsel %vm243_vm13, %v245_v13, %v241_v15 }
 0x19f   :  { %v264_v20 = vmul.f32 %v455_v8, %v263_v16  ;;  %431 = vmatmul.msk.f32.vlgmr.msrb.gmra.mxu2 %vm182_vm1, %v277_v17  ;;  %281 = vst.msk [vmem:[#allocation9 + $0x10] sm:$0xff] %vm182_vm1, %v277_v17  ;;  %v276_v22 = vmul.f32 %v651_v36, %v246_v19 }
 0x1a1   :  { %v265_v23 = vadd.f32 %v455_v8, %v264_v20  ;;  %430 = vmatmul.msk.f32.vlgmr.msrb.gmra.mxu1 %vm182_vm1, %v276_v22  ;;  %280 = vst.msk [vmem:[#allocation9 + $0x8] sm:$0xff] %vm182_vm1, %v276_v22 }
 0x1a3   :  { %v269_v25 = vsel %vm268_vm2, %v455_v8, %v265_v23 }
 0x1a4   :  { %v274_v26 = vsel %vm271_vm3, %v273_v24, %v269_v25 }
 0x1a5   :  { %v278_v27 = vmul.f32 %v655_v38, %v274_v26 }
 0x1a7   :  { %432 = vmatmul.msk.f32.vlgmr.msrb.gmra.mxu3 %vm182_vm1, %v278_v27  ;;  %282 = vst.msk [vmem:[#allocation9 + $0x18] sm:$0xff] %vm182_vm1, %v278_v27 }
 0x1a8   :  { %408 = dma.vmem_to_hbm [thread:$0]  %s401_s30, 512, %s403_s7, [#allocation10], %s585_s23, %s585_s23, %s586_s24  }
 0x216   :  { %v307_v28 = vpop.f32.mrf.mxu0 }
 0x217   :  { %379 = vst.msk [vmem:[#allocation8] sm:$0xff] %vm77_vm0, %v307_v28 }
 0x21e   :  { %v330_v29 = vpop.f32.mrf.mxu1 }
 0x21f   :  { %380 = vst.msk [vmem:[#allocation8 + $0x8] sm:$0xff] %vm77_vm0, %v330_v29 }
 0x222   :  { %v353_v30 = vpop.f32.mrf.mxu2 }
 0x223   :  { %381 = vst.msk [vmem:[#allocation8 + $0x10] sm:$0xff] %vm77_vm0, %v353_v30 }
 0x22a   :  { %v376_v31 = vpop.f32.mrf.mxu3 }
 0x22b   :  { %382 = vst.msk [vmem:[#allocation8 + $0x18] sm:$0xff] %vm77_vm0, %v376_v31 }
 0x22c   :  { %395 = dma.vmem_to_hbm [thread:$0]  %s388_s9, 512, %s390_s4, [#allocation4], %s585_s23, %s585_s23, %s586_s24  }
 0x22d   :  { %580 = dma.done.wait [#allocation4], 512  }
 0x22e   :  { %581 = vsyncadd [#allocation4], 4294966784 }
 0x22f   :  { %582 = dma.done.wait [#allocation10], 512  }
 0x230   :  { %583 = vsyncadd [#allocation10], 4294966784 }
 0x231   :  { %417 = vsyncpa [#allocation3], 1 }
 0x232   :  { %418 = vsyncpa [#allocation6], 1 }
 0x233   :  { %419 = vsyncpa [#allocation4], 1 }
 0x234   :  { %420 = vsyncpa [#allocation10], 1 }

</bundles_post_ra>
